<compile_context>
chip_gen: v7x
topology: tpu7x:2x2x1
jax: 0.10.0
libtpu: 0.0.40
codegen_flags: <defaults>
</compile_context>

<pallas_src>
import functools
import math

import jax
import jax.numpy as jnp
from jax.experimental import pallas as pl
from jax.experimental.pallas import tpu as pltpu


def _stage_block_kernel(x_ref, w1_ref, b1_ref, w2_ref, b2_ref, mask_ref, *rest,
                        K, S, CIN, COUT, P, WIN, NF, B, RESIDUAL):
    """Whole StageBlock forward for B images (one grid step).

    x_ref   : (B, S*S*CIN, LIN) bf16  -- per-group flat (row-major, row width WIN)
                                         zero-padded + space-to-depth'd input
    w1_ref  : (COUT, K*K*CIN)  bf16   -- columns ordered (kh, kw, ci)
    w2_ref  : (COUT, K*K*COUT) bf16
    b?_ref  : (COUT, 1) f32
    mask_ref: (1, NF) f32             -- 1.0 on valid output columns, 0.0 on pad/garbage
    id_ref  : (B, CIN, NF) f32        -- only when RESIDUAL (identity, padded to width WIN)
    o_ref   : (B, COUT, NF) f32       -- CHW-flat, row width WIN (lane-dense stores)
    hp_ref  : VMEM (COUT, LH) bf16    -- conv2's zero-padded input, flat, row width WIN
    """
    if RESIDUAL:
        id_ref, o_ref, hp_ref = rest
    else:
        o_ref, hp_ref = rest

    # Zero the padded scratch ONCE; every step fully overwrites the same
    # interior region, so the halo/tail stay zero for all subsequent steps.
    @pl.when(pl.program_id(0) == 0)
    def _():
        hp_ref[...] = jnp.zeros_like(hp_ref)

    mask = mask_ref[...]                       # (1, NF) f32
    start2 = P * WIN + P                       # conv1 result lands here in hp (flat)

    for b in range(B):                         # static unroll over images in the block
        # ----------------- conv1 (transposed im2col) -------------------------
        # Each tap is a contiguous lane slice of the flat per-group input.
        taps = []
        for kh in range(K):
            for kw in range(K):
                g = (kh % S) * S + (kw % S)            # space-to-depth group
                off = (kh // S) * WIN + (kw // S)      # flat offset inside the group
                taps.append(x_ref[b, g * CIN:(g + 1) * CIN, off:off + NF])
        p1 = jnp.concatenate(taps, axis=0) if len(taps) > 1 else taps[0]  # (K*K*CIN, NF)
        h = jnp.dot(w1_ref[...], p1, preferred_element_type=jnp.float32)  # (COUT, NF) f32
        h = jnp.maximum(h + b1_ref[...], 0.0) * mask   # bias+ReLU, zero the pad columns

        # One contiguous store writes conv2's interior AND its horizontal zero
        # padding (masked columns) — no per-row scatter, no relayout.
        hp_ref[:, start2:start2 + NF] = h.astype(hp_ref.dtype)

        # ----------------- conv2 (transposed im2col) -------------------------
        taps2 = []
        for kh in range(K):
            for kw in range(K):
                off = kh * WIN + kw
                taps2.append(hp_ref[:, off:off + NF])
        p2 = jnp.concatenate(taps2, axis=0)                               # (K*K*COUT, NF)
        y = jnp.dot(w2_ref[...], p2, preferred_element_type=jnp.float32)  # (COUT, NF) f32
        y = jnp.maximum(y + b2_ref[...], 0.0) * mask

        # ----------------- fused residual + lane-dense store ------------------
        if RESIDUAL:
            y = y + id_ref[b]                  # PyTorch-style broadcast over channels, f32
        o_ref[b] = y.astype(o_ref.dtype)


def _pick_batch_per_step(n):
    """Images per grid step: amortize per-step overhead at large n, but keep
    >=2 grid steps when n>=2 so both v7x TensorCores get work."""
    upper = max(1, min(8, n // 2))
    b = 1
    for d in range(1, n + 1):
        if n % d == 0 and d <= upper:
            b = d
    return b


def stage_block_forward(x_nchw, w1, b1, w2, b2, *, stride, kernel_size,
                        is_down_sample):
    """ReLU(conv2(ReLU(conv1(x)))) [+ identity], matching the PyTorch module."""
    n, cin, h, w = x_nchw.shape
    cout = w1.shape[0]
    k, s, p = kernel_size, stride, kernel_size // 2
    ho = (h + 2 * p - k) // s + 1
    wo = (w + 2 * p - k) // s + 1

    win = wo + 2 * p                 # canvas row width == conv2's padded row width
    hn = ho + (k - 1) // s           # space-to-depth rows needed by conv1
    wn_data = wo + (k - 1) // s      # space-to-depth cols needed by conv1
    nf = ho * win                    # flattened matmul N dim (lane-dense)
    lin = (hn + 1) * win             # flat per-group input length (+1 row of tap tail)
    grp = s * s

    # ---------------- input prep (tiny, one-shot, in bf16) --------------------
    xb = x_nchw.astype(jnp.bfloat16)
    xp = jnp.pad(xb, ((0, 0), (0, 0),
                      (p, p + max(0, s * hn - (h + 2 * p))),
                      (p, p + max(0, s * wn_data - (w + 2 * p)))))
    groups = []
    for a in range(s):
        for b_ in range(s):
            xg = xp[:, :, a::s, b_::s][:, :, :hn, :wn_data]
            xg = jnp.pad(xg, ((0, 0), (0, 0), (0, 0), (0, win - wn_data)))
            groups.append(xg)
    xg_all = groups[0] if s == 1 else jnp.concatenate(groups, axis=1)
    x_in = xg_all.reshape(n, grp * cin, hn * win)
    x_in = jnp.pad(x_in, ((0, 0), (0, 0), (0, lin - hn * win)))      # (n, G*CIN, LIN) bf16

    # Transposed im2col weights: (COUT, K*K*C), columns ordered (kh, kw, ci).
    w1r = jnp.transpose(w1, (0, 2, 3, 1)).reshape(cout, k * k * cin).astype(jnp.bfloat16)
    w2r = jnp.transpose(w2, (0, 2, 3, 1)).reshape(cout, k * k * cout).astype(jnp.bfloat16)
    b1r = b1.reshape(cout, 1).astype(jnp.float32)
    b2r = b2.reshape(cout, 1).astype(jnp.float32)

    # Valid-column mask (passed in, so the kernel needs no in-kernel iota/mod).
    mask = (jnp.arange(nf) % win < wo).astype(jnp.float32).reshape(1, nf)

    residual = not is_down_sample
    bsz = _pick_batch_per_step(n)

    inputs = [x_in, w1r, b1r, w2r, b2r, mask]
    in_specs = [
        pl.BlockSpec((bsz, grp * cin, lin), lambda i: (i, 0, 0)),
        pl.BlockSpec((cout, k * k * cin), lambda i: (0, 0)),
        pl.BlockSpec((cout, 1), lambda i: (0, 0)),
        pl.BlockSpec((cout, k * k * cout), lambda i: (0, 0)),
        pl.BlockSpec((cout, 1), lambda i: (0, 0)),
        pl.BlockSpec((1, nf), lambda i: (0, 0)),
    ]
    if residual:
        if (h, w) != (ho, wo) or not (cin == 1 or cin == cout):
            raise ValueError("identity + X is not broadcastable (same as PyTorch)")
        # Identity in the same padded-row flat layout (zeros in the pad columns).
        idp = jnp.pad(x_nchw.astype(jnp.float32),
                      ((0, 0), (0, 0), (0, 0), (0, win - wo)))
        inputs.append(idp.reshape(n, cin, nf))
        in_specs.append(pl.BlockSpec((bsz, cin, nf), lambda i: (i, 0, 0)))

    lh = (ho + 2 * p) * win + win                 # conv2 padded input, flat, + tap tail
    kern = functools.partial(_stage_block_kernel, K=k, S=s, CIN=cin, COUT=cout,
                             P=p, WIN=win, NF=nf, B=bsz, RESIDUAL=residual)

    # TODO(synk): for real ResNet-sized images, add a second grid axis over
    # output-row tiles with a (K-1)-row halo (contiguous overlap in this flat
    # layout) and re-derive tile sizes for v7x's 64 MiB VMEM; whole-image
    # blocks are optimal only at these toy sizes.
    out = pl.pallas_call(
        kern,
        out_shape=jax.ShapeDtypeStruct((n, cout, nf), jnp.float32),
        grid=(n // bsz,),
        in_specs=in_specs,
        out_specs=pl.BlockSpec((bsz, cout, nf), lambda i: (i, 0, 0)),
        scratch_shapes=[pltpu.VMEM((cout, lh), jnp.bfloat16)],
        compiler_params=pltpu.CompilerParams(
            dimension_semantics=("parallel",),
            vmem_limit_bytes=32 * 1024 * 1024),
    )(*inputs)

    # Drop the (K-1) pad/garbage columns of each flat row (tiny wrapper slice;
    # the kernel's stores stay lane-dense at width win >= 128 per row block).
    return out.reshape(n, cout, ho, win)[:, :, :, :wo]


class StageBlockPallas:
    """JAX/Pallas re-implementation of multi_label.model.resnet.StageBlock."""

    def __init__(self, in_channels, out_channels, stride, kernel_size, key):
        k1, k2, k3, k4 = jax.random.split(key, 4)
        fan1 = in_channels * kernel_size * kernel_size
        bnd1 = 1.0 / math.sqrt(fan1)
        self.w1 = jax.random.uniform(
            k1, (out_channels, in_channels, kernel_size, kernel_size),
            jnp.float32, -bnd1, bnd1)
        self.b1 = jax.random.uniform(k2, (out_channels,), jnp.float32, -bnd1, bnd1)
        fan2 = out_channels * kernel_size * kernel_size
        bnd2 = 1.0 / math.sqrt(fan2)
        self.w2 = jax.random.uniform(
            k3, (out_channels, out_channels, kernel_size, kernel_size),
            jnp.float32, -bnd2, bnd2)
        self.b2 = jax.random.uniform(k4, (out_channels,), jnp.float32, -bnd2, bnd2)
        self.stride = stride
        self.kernel_size = kernel_size
        # Reproduces the (oddly-named) flag of the reference module verbatim.
        self.is_down_sample = in_channels == out_channels

    def __call__(self, x_nchw):
        return stage_block_forward(
            x_nchw, self.w1, self.b1, self.w2, self.b2,
            stride=self.stride, kernel_size=self.kernel_size,
            is_down_sample=self.is_down_sample)


def _reference(x, w1, b1, w2, b2, stride, k, is_down_sample):
    """Pure-JAX f32 reference of the PyTorch forward (correctness check)."""
    pad = k // 2

    def conv(inp, w, b, s):
        y = jax.lax.conv_general_dilated(
            inp, w, (s, s), [(pad, pad), (pad, pad)],
            dimension_numbers=("NCHW", "OIHW", "NCHW"),
            precision=jax.lax.Precision.HIGHEST)
        return jnp.maximum(y + b.reshape(1, -1, 1, 1), 0.0)

    y = conv(x, w1, b1, stride)
    y = conv(y, w2, b2, 1)
    return y if is_down_sample else x + y


if __name__ == "__main__":
    root = jax.random.PRNGKey(0)
    kxa, kxb, kpa, kpb, kpc = jax.random.split(root, 5)
    # Kernel matmuls run on the bf16 MXU with f32 accumulation; compare against
    # an f32 reference with a correspondingly relaxed (but meaningful) tolerance.
    TOL = dict(rtol=2e-2, atol=2e-2)

    # Config A: in_channels == out_channels -> is_down_sample path (conv stack only).
    xa = jax.random.normal(kxa, (2, 8, 16, 16), jnp.float32)
    blk_a = StageBlockPallas(8, 8, stride=1, kernel_size=3, key=kpa)
    out_a = jax.block_until_ready(blk_a(xa))
    ref_a = _reference(xa, blk_a.w1, blk_a.b1, blk_a.w2, blk_a.b2, 1, 3,
                       blk_a.is_down_sample)
    assert out_a.shape == (2, 8, 16, 16)
    assert jnp.allclose(out_a, ref_a, **TOL)

    # Config A2: stride=2 spatial downsampling (stride fused via space-to-depth).
    blk_c = StageBlockPallas(8, 8, stride=2, kernel_size=3, key=kpc)
    out_c = jax.block_until_ready(blk_c(xa))
    ref_c = _reference(xa, blk_c.w1, blk_c.b1, blk_c.w2, blk_c.b2, 2, 3,
                       blk_c.is_down_sample)
    assert out_c.shape == (2, 8, 8, 8)
    assert jnp.allclose(out_c, ref_c, **TOL)

    # Config B: in_channels != out_channels -> residual `identity + X` path
    # (in_channels=1 so the PyTorch broadcast is well-defined).
    xb = jax.random.normal(kxb, (2, 1, 16, 16), jnp.float32)
    blk_b = StageBlockPallas(1, 8, stride=1, kernel_size=3, key=kpb)
    out_b = jax.block_until_ready(blk_b(xb))
    ref_b = _reference(xb, blk_b.w1, blk_b.b1, blk_b.w2, blk_b.b2, 1, 3,
                       blk_b.is_down_sample)
    assert out_b.shape == (2, 8, 16, 16)
    assert jnp.allclose(out_b, ref_b, **TOL)

    print("KERNEL_OK")
</pallas_src>

<mosaic_0001>
module attributes {stable_mosaic.version = 11 : i64} {
  func.func @_stage_block_kernel(%arg0: i32, %arg1: memref<1x8x342xbf16, #tpu.memory_space<vmem>>, %arg2: memref<8x72xbf16, #tpu.memory_space<vmem>>, %arg3: memref<8x1xf32, #tpu.memory_space<vmem>>, %arg4: memref<8x72xbf16, #tpu.memory_space<vmem>>, %arg5: memref<8x1xf32, #tpu.memory_space<vmem>>, %arg6: memref<1x288xf32, #tpu.memory_space<vmem>>, %arg7: memref<1x8x288xf32, #tpu.memory_space<vmem>>, %arg8: memref<8x342xbf16, #tpu.memory_space<vmem>>) attributes {dimension_semantics = [#tpu.dimension_semantics<parallel>], iteration_bounds = array<i64: 2>, scalar_prefetch = 0 : i64, scratch_operands = 1 : i64, tpu.core_type = #tpu.core_type<tc>, window_params = [{transform_indices = @transform_0, window_bounds = array<i64: 1, 8, 342>}, {pipeline_mode = #tpu.pipeline_mode<synchronous>, transform_indices = @transform_1, window_bounds = array<i64: 8, 72>}, {pipeline_mode = #tpu.pipeline_mode<synchronous>, transform_indices = @transform_2, window_bounds = array<i64: 8, 1>}, {pipeline_mode = #tpu.pipeline_mode<synchronous>, transform_indices = @transform_3, window_bounds = array<i64: 8, 72>}, {pipeline_mode = #tpu.pipeline_mode<synchronous>, transform_indices = @transform_4, window_bounds = array<i64: 8, 1>}, {pipeline_mode = #tpu.pipeline_mode<synchronous>, transform_indices = @transform_5, window_bounds = array<i64: 1, 288>}, {transform_indices = @transform_6, window_bounds = array<i64: 1, 8, 288>}]} {
    %c0_i32 = arith.constant 0 : i32
    %0 = arith.cmpi eq, %arg0, %c0_i32 : i32
    %1 = arith.extui %0 : i1 to i32
    %c0_i32_0 = arith.constant 0 : i32
    %2 = arith.cmpi ne, %1, %c0_i32_0 : i32
    scf.if %2 {
      %cst_55 = arith.constant 0.000000e+00 : bf16
      %56 = vector.broadcast %cst_55 : bf16 to vector<8x342xbf16>
      %c0_56 = arith.constant 0 : index
      %c0_57 = arith.constant 0 : index
      %57 = vector.load %arg8[%c0_56, %c0_57] : memref<8x342xbf16, #tpu.memory_space<vmem>>, vector<8x342xbf16>
      tpu.vector_store %arg8[%c0_56, %c0_57], %56 {strides = array<i32>} : memref<8x342xbf16, #tpu.memory_space<vmem>>, vector<8x342xbf16>,
    } else {
    }
    %c0 = arith.constant 0 : index
    %c0_1 = arith.constant 0 : index
    %3 = vector.load %arg6[%c0, %c0_1] : memref<1x288xf32, #tpu.memory_space<vmem>>, vector<1x288xf32>
    %c0_2 = arith.constant 0 : index
    %c0_3 = arith.constant 0 : index
    %c0_4 = arith.constant 0 : index
    %4 = vector.load %arg1[%c0_2, %c0_3, %c0_4] : memref<1x8x342xbf16, #tpu.memory_space<vmem>>, vector<1x8x288xbf16>
    %5 = vector.shape_cast %4 : vector<1x8x288xbf16> to vector<8x288xbf16>
    %c0_5 = arith.constant 0 : index
    %c0_6 = arith.constant 0 : index
    %c1 = arith.constant 1 : index
    %6 = vector.load %arg1[%c0_5, %c0_6, %c1] : memref<1x8x342xbf16, #tpu.memory_space<vmem>>, vector<1x8x288xbf16>
    %7 = vector.shape_cast %6 : vector<1x8x288xbf16> to vector<8x288xbf16>
    %c0_7 = arith.constant 0 : index
    %c0_8 = arith.constant 0 : index
    %c2 = arith.constant 2 : index
    %8 = vector.load %arg1[%c0_7, %c0_8, %c2] : memref<1x8x342xbf16, #tpu.memory_space<vmem>>, vector<1x8x288xbf16>
    %9 = vector.shape_cast %8 : vector<1x8x288xbf16> to vector<8x288xbf16>
    %c0_9 = arith.constant 0 : index
    %c0_10 = arith.constant 0 : index
    %c18 = arith.constant 18 : index
    %10 = vector.load %arg1[%c0_9, %c0_10, %c18] : memref<1x8x342xbf16, #tpu.memory_space<vmem>>, vector<1x8x288xbf16>
    %11 = vector.shape_cast %10 : vector<1x8x288xbf16> to vector<8x288xbf16>
    %c0_11 = arith.constant 0 : index
    %c0_12 = arith.constant 0 : index
    %c19 = arith.constant 19 : index
    %12 = vector.load %arg1[%c0_11, %c0_12, %c19] : memref<1x8x342xbf16, #tpu.memory_space<vmem>>, vector<1x8x288xbf16>
    %13 = vector.shape_cast %12 : vector<1x8x288xbf16> to vector<8x288xbf16>
    %c0_13 = arith.constant 0 : index
    %c0_14 = arith.constant 0 : index
    %c20 = arith.constant 20 : index
    %14 = vector.load %arg1[%c0_13, %c0_14, %c20] : memref<1x8x342xbf16, #tpu.memory_space<vmem>>, vector<1x8x288xbf16>
    %15 = vector.shape_cast %14 : vector<1x8x288xbf16> to vector<8x288xbf16>
    %c0_15 = arith.constant 0 : index
    %c0_16 = arith.constant 0 : index
    %c36 = arith.constant 36 : index
    %16 = vector.load %arg1[%c0_15, %c0_16, %c36] : memref<1x8x342xbf16, #tpu.memory_space<vmem>>, vector<1x8x288xbf16>
    %17 = vector.shape_cast %16 : vector<1x8x288xbf16> to vector<8x288xbf16>
    %c0_17 = arith.constant 0 : index
    %c0_18 = arith.constant 0 : index
    %c37 = arith.constant 37 : index
    %18 = vector.load %arg1[%c0_17, %c0_18, %c37] : memref<1x8x342xbf16, #tpu.memory_space<vmem>>, vector<1x8x288xbf16>
    %19 = vector.shape_cast %18 : vector<1x8x288xbf16> to vector<8x288xbf16>
    %c0_19 = arith.constant 0 : index
    %c0_20 = arith.constant 0 : index
    %c38 = arith.constant 38 : index
    %20 = vector.load %arg1[%c0_19, %c0_20, %c38] : memref<1x8x342xbf16, #tpu.memory_space<vmem>>, vector<1x8x288xbf16>
    %21 = vector.shape_cast %20 : vector<1x8x288xbf16> to vector<8x288xbf16>
    %22 = tpu.concatenate %5, %7, %9, %11, %13, %15, %17, %19, %21 in 0 : vector<8x288xbf16>, vector<8x288xbf16>, vector<8x288xbf16>, vector<8x288xbf16>, vector<8x288xbf16>, vector<8x288xbf16>, vector<8x288xbf16>, vector<8x288xbf16>, vector<8x288xbf16> -> vector<72x288xbf16>
    %c0_21 = arith.constant 0 : index
    %c0_22 = arith.constant 0 : index
    %23 = vector.load %arg2[%c0_21, %c0_22] : memref<8x72xbf16, #tpu.memory_space<vmem>>, vector<8x72xbf16>
    %cst = arith.constant dense<0.000000e+00> : vector<8x288xf32>
    %24 = tpu.matmul %23, %22, %cst {dimension_numbers = #tpu.dot_dimension_numbers<[1], [0], [0], [1], [0, 0, 1, 1], [], []>} : vector<8x72xbf16>, vector<72x288xbf16>, vector<8x288xf32> -> vector<8x288xf32>
    %c0_23 = arith.constant 0 : index
    %c0_24 = arith.constant 0 : index
    %25 = vector.load %arg3[%c0_23, %c0_24] : memref<8x1xf32, #tpu.memory_space<vmem>>, vector<8x1xf32>
    %26 = vector.broadcast %25 : vector<8x1xf32> to vector<8x288xf32>
    %27 = arith.addf %24, %26 : vector<8x288xf32>
    %cst_25 = arith.constant 0.000000e+00 : f32
    %28 = vector.broadcast %cst_25 : f32 to vector<8x288xf32>
    %29 = arith.maximumf %27, %28 : vector<8x288xf32>
    %30 = vector.broadcast %3 : vector<1x288xf32> to vector<8x288xf32>
    %31 = arith.mulf %29, %30 : vector<8x288xf32>
    %32 = arith.truncf %31 : vector<8x288xf32> to vector<8x288xbf16>
    %c0_26 = arith.constant 0 : index
    %c19_27 = arith.constant 19 : index
    %33 = vector.load %arg8[%c0_26, %c19_27] : memref<8x342xbf16, #tpu.memory_space<vmem>>, vector<8x288xbf16>
    tpu.vector_store %arg8[%c0_26, %c19_27], %32 {strides = array<i32>} : memref<8x342xbf16, #tpu.memory_space<vmem>>, vector<8x288xbf16>,
    %c0_28 = arith.constant 0 : index
    %c0_29 = arith.constant 0 : index
    %34 = vector.load %arg8[%c0_28, %c0_29] : memref<8x342xbf16, #tpu.memory_space<vmem>>, vector<8x288xbf16>
    %c0_30 = arith.constant 0 : index
    %c1_31 = arith.constant 1 : index
    %35 = vector.load %arg8[%c0_30, %c1_31] : memref<8x342xbf16, #tpu.memory_space<vmem>>, vector<8x288xbf16>
    %c0_32 = arith.constant 0 : index
    %c2_33 = arith.constant 2 : index
    %36 = vector.load %arg8[%c0_32, %c2_33] : memref<8x342xbf16, #tpu.memory_space<vmem>>, vector<8x288xbf16>
    %c0_34 = arith.constant 0 : index
    %c18_35 = arith.constant 18 : index
    %37 = vector.load %arg8[%c0_34, %c18_35] : memref<8x342xbf16, #tpu.memory_space<vmem>>, vector<8x288xbf16>
    %c0_36 = arith.constant 0 : index
    %c19_37 = arith.constant 19 : index
    %38 = vector.load %arg8[%c0_36, %c19_37] : memref<8x342xbf16, #tpu.memory_space<vmem>>, vector<8x288xbf16>
    %c0_38 = arith.constant 0 : index
    %c20_39 = arith.constant 20 : index
    %39 = vector.load %arg8[%c0_38, %c20_39] : memref<8x342xbf16, #tpu.memory_space<vmem>>, vector<8x288xbf16>
    %c0_40 = arith.constant 0 : index
    %c36_41 = arith.constant 36 : index
    %40 = vector.load %arg8[%c0_40, %c36_41] : memref<8x342xbf16, #tpu.memory_space<vmem>>, vector<8x288xbf16>
    %c0_42 = arith.constant 0 : index
    %c37_43 = arith.constant 37 : index
    %41 = vector.load %arg8[%c0_42, %c37_43] : memref<8x342xbf16, #tpu.memory_space<vmem>>, vector<8x288xbf16>
    %c0_44 = arith.constant 0 : index
    %c38_45 = arith.constant 38 : index
    %42 = vector.load %arg8[%c0_44, %c38_45] : memref<8x342xbf16, #tpu.memory_space<vmem>>, vector<8x288xbf16>
    %43 = tpu.concatenate %34, %35, %36, %37, %38, %39, %40, %41, %42 in 0 : vector<8x288xbf16>, vector<8x288xbf16>, vector<8x288xbf16>, vector<8x288xbf16>, vector<8x288xbf16>, vector<8x288xbf16>, vector<8x288xbf16>, vector<8x288xbf16>, vector<8x288xbf16> -> vector<72x288xbf16>
    %c0_46 = arith.constant 0 : index
    %c0_47 = arith.constant 0 : index
    %44 = vector.load %arg4[%c0_46, %c0_47] : memref<8x72xbf16, #tpu.memory_space<vmem>>, vector<8x72xbf16>
    %cst_48 = arith.constant dense<0.000000e+00> : vector<8x288xf32>
    %45 = tpu.matmul %44, %43, %cst_48 {dimension_numbers = #tpu.dot_dimension_numbers<[1], [0], [0], [1], [0, 0, 1, 1], [], []>} : vector<8x72xbf16>, vector<72x288xbf16>, vector<8x288xf32> -> vector<8x288xf32>
    %c0_49 = arith.constant 0 : index
    %c0_50 = arith.constant 0 : index
    %46 = vector.load %arg5[%c0_49, %c0_50] : memref<8x1xf32, #tpu.memory_space<vmem>>, vector<8x1xf32>
    %47 = vector.broadcast %46 : vector<8x1xf32> to vector<8x288xf32>
    %48 = arith.addf %45, %47 : vector<8x288xf32>
    %cst_51 = arith.constant 0.000000e+00 : f32
    %49 = vector.broadcast %cst_51 : f32 to vector<8x288xf32>
    %50 = arith.maximumf %48, %49 : vector<8x288xf32>
    %51 = vector.broadcast %3 : vector<1x288xf32> to vector<8x288xf32>
    %52 = arith.mulf %50, %51 : vector<8x288xf32>
    %c0_52 = arith.constant 0 : index
    %c0_53 = arith.constant 0 : index
    %c0_54 = arith.constant 0 : index
    %53 = vector.load %arg7[%c0_52, %c0_53, %c0_54] : memref<1x8x288xf32, #tpu.memory_space<vmem>>, vector<1x8x288xf32>
    %54 = vector.shape_cast %53 : vector<1x8x288xf32> to vector<8x288xf32>
    %55 = vector.shape_cast %52 : vector<8x288xf32> to vector<1x8x288xf32>
    tpu.vector_store %arg7[%c0_52, %c0_53, %c0_54], %55 {strides = array<i32>} : memref<1x8x288xf32, #tpu.memory_space<vmem>>, vector<1x8x288xf32>,
    return
  }
  func.func @transform_0(%arg0: i32) -> (i32, i32, i32) {
    %c0_i32 = arith.constant 0 : i32
    %c0_i32_0 = arith.constant 0 : i32
    %c0_i32_1 = arith.constant 0 : i32
    return %arg0, %c0_i32, %c0_i32_0 : i32, i32, i32
  }
  func.func @transform_1(%arg0: i32) -> (i32, i32) {
    %c0_i32 = arith.constant 0 : i32
    %c0_i32_0 = arith.constant 0 : i32
    %c0_i32_1 = arith.constant 0 : i32
    return %c0_i32, %c0_i32_0 : i32, i32
  }
  func.func @transform_2(%arg0: i32) -> (i32, i32) {
    %c0_i32 = arith.constant 0 : i32
    %c0_i32_0 = arith.constant 0 : i32
    %c0_i32_1 = arith.constant 0 : i32
    return %c0_i32, %c0_i32_0 : i32, i32
  }
  func.func @transform_3(%arg0: i32) -> (i32, i32) {
    %c0_i32 = arith.constant 0 : i32
    %c0_i32_0 = arith.constant 0 : i32
    %c0_i32_1 = arith.constant 0 : i32
    return %c0_i32, %c0_i32_0 : i32, i32
  }
  func.func @transform_4(%arg0: i32) -> (i32, i32) {
    %c0_i32 = arith.constant 0 : i32
    %c0_i32_0 = arith.constant 0 : i32
    %c0_i32_1 = arith.constant 0 : i32
    return %c0_i32, %c0_i32_0 : i32, i32
  }
  func.func @transform_5(%arg0: i32) -> (i32, i32) {
    %c0_i32 = arith.constant 0 : i32
    %c0_i32_0 = arith.constant 0 : i32
    %c0_i32_1 = arith.constant 0 : i32
    return %c0_i32, %c0_i32_0 : i32, i32
  }
  func.func @transform_6(%arg0: i32) -> (i32, i32, i32) {
    %c0_i32 = arith.constant 0 : i32
    %c0_i32_0 = arith.constant 0 : i32
    %c0_i32_1 = arith.constant 0 : i32
    return %arg0, %c0_i32, %c0_i32_0 : i32, i32, i32
  }
}

</mosaic_0001>

<bundles_post_ra>
// kernel: tpu_custom_call.1
= control target key start
LH: loop header
LB: loop body
LE: loop exit
PB: predicated region body
PF: predicated region fallthrough
CT: control target
= control target key end

     0   :  { %11 = vsyncpa [#allocation4], 0  ;;  %s1480_s0 = inlined_call_operand.hbm [shape: bf16[2,8,342], index: 0, kind: input, shape index: {}]   ;;  %s1481_s1 = inlined_call_operand.vmem [shape: bf16[8,72], index: 1, kind: input, shape index: {}]   ;;  %s1482_s2 = inlined_call_operand.vmem [shape: f32[8,1], index: 2, kind: input, shape index: {}]   ;;  %s1483_s3 = inlined_call_operand.vmem [shape: bf16[8,72], index: 3, kind: input, shape index: {}]   ;;  %s1484_s4 = inlined_call_operand.vmem [shape: f32[8,1], index: 4, kind: input, shape index: {}]   ;;  %s1485_s5 = inlined_call_operand.vmem [shape: f32[1,288], index: 5, kind: input, shape index: {}]   ;;  %s1486_s6 = inlined_call_operand.hbm [shape: f32[2,8,288], index: 6, kind: output, shape index: {}]  }
   0x1   :  { %13 = vsyncpa [#allocation4 + $0x1], 0 }
   0x2   :  { %14 = vsyncpa [#allocation5], 0 }
   0x3   :  { %16 = vsyncpa [#allocation5 + $0x1], 0  ;;  %s1159_s21 = smov 0   ;;  %s1161_s22 = smov 0  }
   0x4   :  { %s1163_s23 = smov 0   ;;  %s1165_s24 = smov 0  }
   0x5 LB: > { %s1180_s25 = sadd.s32 4294967295, %s1107_s24   ;;  %s875_s26 = sadd.s32 4294967294, %s1107_s24   ;;  %s1107_s24 = sphi %s1165_s24, %s1500_s24   ;;  %s1103_s23 = sphi %s1163_s23, %s1499_s23   ;;  %s1099_s22 = sphi %s1161_s22, %s1498_s22   ;;  %s1095_s21 = sphi %s1159_s21, %s1497_s21  }
   0x6   : > { %s1184_s27 = sadd.s32 1, %s1107_s24   ;;  %s29_s28 = sadd.s32 1, %s1103_s23 }
   0x7   : > { %s26_s29 = ssub.s32 %s1107_s24, %s1184_s27  ;;  %p36_p0 = scmp.ne.s32.totalorder %s1103_s23, %s1099_s22 }
   0x8   : > { %p27_p1 = scmp.eq.s32.totalorder %s26_s29, 0  ;;  %p37_p2 = scmp.eq.s32.totalorder %s1107_s24, 0 }
   0x9   : > { %p42_p3 = scmp.ne.s32.totalorder %s1099_s22, %s1095_s21  ;;  %p43_p4 = scmp.eq.s32.totalorder %s1180_s25, 0 }
   0xa   : > { %s1196_s30 = scalar_select %p27_p1, %s1103_s23, %s29_s28  }
   0xb   : > { %p38_p5 = por %p37_p2, %p36_p0  ;;  %p1198_p6 = por %p43_p4, %p42_p3 }
   0xc   : > { %p171_p7 = scmp.eq.s32.totalorder %s1180_s25, 1  ;;  %p177_p8 = scmp.eq.s32.totalorder %s875_s26, 1 }
   0xd   : > { %p957_p10 = scmp.lt.s32.totalorder %s1107_s24, 2  ;;  %s212_s10 = sand.u32 1, %s1103_s23  }
   0xe   : > { %p1205_p11 = por %p171_p7, %p36_p0  ;;  %p1209_p12 = por %p177_p8, %p42_p3 }
   0xf   : > { %s941_s11 = smul.u32 192, %s1107_s24  ;;  %p1220_p13 = pnand %p957_p10, %p38_p5 }
  0x10   : > { %s1489_s8 = scalar_select %p1205_p11, 1, 0 }
  0x11   : > { %s1490_s9 = scalar_select %p1209_p12, 1, 0 }
  0x12   : > { %s940_s12 = smul.u32 12, %s212_s10  ;;  %s1218_s15 = scalar_lea.hbm %s1480_s0, %s941_s11 }
  0x13   : > { %s213_s19 = scalar_lea.sflag [#allocation4], %s212_s10  ;;  %s1011_s20 = scalar_lea.hbm %s1218_s15, 192 }
  0x14   : > { %s216_s17 = scalar_lea.vmem [#allocation3], %s940_s12  ;;  %p1012_p2 = scmp.ne.s32.totalorder %s1218_s15, %s1011_s20 }
  0x15   : > { %s224_s18 = sshll.u32 %s216_s17, 4  ;;  %p1013_p3 = pneg %p1220_p13  ;;  %s1225_s18 = int_to_ptr.vmem [resolvable:$true] %s224_s18 }
  0x16   : > { %s1016_s29 = scalar_lea.hbm %s1480_s0, 384  ;;  %p1017_p7 = scmp.lt.u32.totalorder %s1218_s15, %s1480_s0 }
  0x17   : > { %p1014_p4 = pnand %p1013_p3, %p1012_p2  ;;  %p1018_p8 = scmp.lt.u32.totalorder %s1016_s29, %s1011_s20 }
  0x18   : > { %p1020_p9 = scmp.lt.u32.totalorder %s1011_s20, %s1218_s15 }
  0x19   : > { %p1015_p5 = pneg %p1014_p4  ;;  %p1019_p10 = por %p1018_p8, %p1017_p7 }
  0x1b   : > { %p1021_p0 = por %p1020_p9, %p1019_p10 }
  0x1d   : > { %p1022_p1 = pnand %p1021_p0, %p1015_p5 }
  0x1f   : > { %1025 = shalt.err (!%p1022_p1)
}
  0x20   : > { %s1026_s10 = scalar_lea.vmem %s1225_s18, 192  ;;  %s1109_s12 = smov [#allocation3]  }
  0x21   : > { %p1027_p2 = scmp.ne.s32.totalorder %s1225_s18, %s1026_s10  ;;  %s1031_s14 = sshll.u32 %s1109_s12, 4  ;;  %s1032_s14 = int_to_ptr.vmem [resolvable:$false] %s1031_s14 }
  0x22   : > { %s1033_s17 = scalar_lea.vmem %s1032_s14, 384  ;;  %p1034_p11 = scmp.lt.s32.totalorder %s1225_s18, %s1032_s14 }
  0x23   : > { %p1029_p4 = pnand %p1027_p2, %p1013_p3  ;;  %p1035_p7 = scmp.lt.s32.totalorder %s1033_s17, %s1026_s10 }
  0x25   : > { %p1030_p12 = pneg %p1029_p4  ;;  %p1036_p8 = por %p1035_p7, %p1034_p11 }
  0x27   : > { %p1037_p9 = pnand %p1036_p8, %p1030_p12 }
  0x29   : > { %1040 = shalt.err (!%p1037_p9)
}
  0x2a   : > { %952 = dma.hbm_to_vmem [thread:$0]  (!%p1220_p13), %s1218_s15, 192, %s1225_s18, %s213_s19  }
  0x2b   : > { %p1492_p0 = scmp.lt.s32.totalorder %s1107_s24, 3  ;;  %p1493_p1 = scmp.ge.s32.totalorder %s1107_s24, 1 }
  0x2d   : > { %p230_p3 = pnand %p1493_p1, %p1492_p0 }
  0x2e   : > { %s1258_s20 = sand.u32 (!%p230_p3), 1, %s1099_s22  }
  0x2f   : > { %233 = sbr.rel (%p230_p3) target bundleno = 977 (0x3d1), region = 44  ;;  %s236_s28 = scalar_lea.sflag (!%p230_p3), [#allocation4], %s1258_s20 }
  0x30   : > { %s942_s26 = smul.u32 (!%p230_p3), 12, %s1258_s20 }
  0x32   : > { %s239_s29 = scalar_lea.vmem (!%p230_p3), [#allocation3], %s942_s26 }
  0x36   : > { %1086 = dma.done.wait (%p1198_p6), %s236_s28, 192  }
  0x37   : > { %1088 = vsyncadd (%p1198_p6), %s236_s28, 4294967104  ;;  %s943_s15 = smul.u32 24, %s1258_s20  ;;  %p880_p11 = scmp.ne.s32.totalorder %s1180_s25, 0 }
  0x38   : > { %vm274_vm0 = vcmask (!%p880_p11), 699392   ;;  %v1110_v0 = vmov (!%p880_p11), 0  }
  0x39   : > { %s1267_s16 = scalar_lea.vmem [#allocation6], %s943_s15  ;;  %272 = sbr.rel (%p880_p11) target bundleno = 64 (0x40), region = 52  ;;  %273 = vst [vmem:[#allocation2] sm:$0xff] (!%p880_p11), %v1110_v0  ;;  %275 = vst.msk [vmem:[#allocation2 + $0x8] sm:$0xf] (!%p880_p11), %vm274_vm0, %v1110_v0 }
  0x40 PF: > { %v277_v1 = vld [vmem:[%s239_s29] sm:$0xff]  ;;  %v1111_v4 = vmov 0.0   ;;  %s1112_s7 = smov 127   ;;  %v1007_v5 = vld [vmem:[%s239_s29 + $0x8] ss:$0 sps:$4 sm:$0xff]   ;;  %s1113_s18 = smov 126   ;;  %v513_v63 = vlaneseq }
  0x41   : > { %v882_v2 = vcombine.high %v277_v1, %v277_v1  ;;  %v881_v3 = vcombine.low %v277_v1, %v277_v1  ;;  %912 = vmatprep.subr.bf16.mxu1 %v1111_v4  ;;  %s1114_s19 = smov 110   ;;  %s1115_s11 = smov 109   ;;  %v1119_v6 = vmov 0   ;;  %vm1120_vm1 = vmmov 0   ;;  %v409_v7 = vld [vmem:[%s1482_s2] sm:$0xff] }
  0x42   : > { %s1116_s13 = smov 108   ;;  %s1117_s10 = smov 92   ;;  %460 = vmatprep.mubr.bf16.mxu0 %v1119_v6  ;;  %1004 = vset.pattern.permute.xlu0 %v1119_v6  ;;  %vm293_vm2 = vcmask 1039360   ;;  %vm359_vm3 = vcmask 1043456   ;;  %vm302_vm4 = vcmask 1031168   ;;  %vm311_vm5 = vcmask 900096  }
  0x43   : > { %289 = vrot.lane.b32.xlu0 %v882_v2, %s1112_s7  ;;  %287 = vrot.lane.b32.xlu1 %v881_v3, %s1112_s7  ;;  %s1118_s12 = smov 91   ;;  %s1121_s14 = smov 90   ;;  %vm320_vm6 = vcmask 891904   ;;  %vm329_vm7 = vcmask 883712   ;;  %vm338_vm8 = vcmask 752640   ;;  %vm347_vm9 = vcmask 744448  }
  0x44   : > { %922 = vmatprep.mubr.msk.bf16.mxu1 %vm1120_vm1, %v1111_v4  ;;  %vm356_vm10 = vcmask 736256   ;;  %v408_v62 = vld [vmem:[%s1481_s1] sm:$0xf]  ;;  %vm415_vm11 = vcmask 588800   ;;  %v514_v0 = vshrl.u32 %v513_v63, 7  ;;  %s1122_s26 = smov 19  }
  0x45   : > { %vm552_vm12 = vcmask 1043608   ;;  %vm553_vm13 = vcmask 1047556   ;;  %vm547_vm14 = vcmask 154624   ;;  %vm556_vm0 = vcmask 412672   ;;  %p1494_p12 = scmp.ne.s32.totalorder %s1489_s8, 0  ;;  %s1123_s15 = smov [#allocation6]  }
  0x46   : > { %vm554_vm15 = vmor %vm553_vm13, %vm552_vm12  ;;  %s1045_s17 = sshll.u32 %s1123_s15, 4  ;;  %s1046_s17 = int_to_ptr.vmem [resolvable:$false] %s1045_s17 }
  0x47   : > { %291 = vrot.lane.b32.xlu0 %v1007_v5, %s1112_s7  ;;  %298 = vrot.lane.b32.xlu1 %v882_v2, %s1113_s18 }
  0x4b   : > { %300 = vrot.lane.b32.xlu0 %v1007_v5, %s1113_s18  ;;  %307 = vrot.lane.b32.xlu1 %v882_v2, %s1114_s19 }
  0x4f   : > { %309 = vrot.lane.b32.xlu0 %v1007_v5, %s1114_s19  ;;  %296 = vrot.lane.b32.xlu1 %v881_v3, %s1113_s18 }
  0x53   : > { %305 = vrot.lane.b32.xlu0 %v881_v3, %s1114_s19  ;;  %316 = vrot.lane.b32.xlu1 %v882_v2, %s1115_s11 }
  0x57   : > { %318 = vrot.lane.b32.xlu0 %v1007_v5, %s1115_s11  ;;  %325 = vrot.lane.b32.xlu1 %v882_v2, %s1116_s13 }
  0x5b   : > { %327 = vrot.lane.b32.xlu0 %v1007_v5, %s1116_s13  ;;  %314 = vrot.lane.b32.xlu1 %v881_v3, %s1115_s11 }
  0x5f   : > { %323 = vrot.lane.b32.xlu0 %v881_v3, %s1116_s13  ;;  %334 = vrot.lane.b32.xlu1 %v882_v2, %s1117_s10 }
  0x63   : > { %336 = vrot.lane.b32.xlu0 %v1007_v5, %s1117_s10  ;;  %343 = vrot.lane.b32.xlu1 %v882_v2, %s1118_s12 }
  0x67   : > { %345 = vrot.lane.b32.xlu0 %v1007_v5, %s1118_s12  ;;  %332 = vrot.lane.b32.xlu1 %v881_v3, %s1117_s10 }
  0x6b   : > { %341 = vrot.lane.b32.xlu0 %v881_v3, %s1118_s12  ;;  %350 = vrot.lane.b32.xlu1 %v881_v3, %s1121_s14 }
  0x6f   : > { %352 = vrot.lane.b32.xlu0 %v882_v2, %s1121_s14  ;;  %354 = vrot.lane.b32.xlu1 %v1007_v5, %s1121_s14 }
  0x73   : > { %412 = vperm.xlu0 %1004, %v409_v7  }
  0xb5   : > { %v290_v8 = vpop.permute.xlu0 %289  ;;  %v288_v9 = vpop.permute.xlu1 %287 }
  0xb6   : > { %v294_v10 = vsel %vm293_vm2, %v288_v9, %v290_v8 }
  0xb7   : > { %v362_v16 = vsel %vm359_vm3, %v881_v3, %v294_v10  ;;  %v276_v3 = vld [vmem:[%s1485_s5] sm:$0x7]  ;;  %v523_v10 = vsub.s32 2, %v514_v0 }
  0xb9   : > { %v292_v11 = vpop.permute.xlu0 %291  ;;  %v299_v12 = vpop.permute.xlu1 %298 }
  0xba   : > { %v295_v13 = vsel %vm293_vm2, %v290_v8, %v292_v11  ;;  %v370_v14 = vsel %vm359_vm3, %v1007_v5, %v292_v11  ;;  %v519_v5 = vsub.s32 1, %v514_v0 }
  0xbb   : > { %913 = vmatpush3.bf16.msra.mxu1 %v370_v14  ;;  %v366_v15 = vsel %vm359_vm3, %v882_v2, %v295_v13  ;;  %v515_v2 = vsub.s32 0, %v514_v0 }
  0xbc   : > { %428 = vmatprep.subr.bf16.mxu0 %v366_v15  ;;  %914 = vmatprep.subr.bf16.mxu1 %v1111_v4 }
  0xbd   : > { %v301_v17 = vpop.permute.xlu0 %300  ;;  %429 = vmatpush1.bf16.msra.mxu0 %v362_v16  ;;  %v308_v18 = vpop.permute.xlu1 %307  ;;  %v1349_v13 = vrot.slane %v276_v3, %v515_v2  ;;  %v1351_v16 = vrot.slane %v276_v3, %v519_v5 }
  0xbe   : > { %v304_v21 = vsel %vm302_vm4, %v299_v12, %v301_v17 }
  0xc1   : > { %v310_v19 = vpop.permute.xlu0 %309  ;;  %v297_v20 = vpop.permute.xlu1 %296 }
  0xc2   : > { %v313_v22 = vsel %vm311_vm5, %v308_v18, %v310_v19  ;;  %v382_v23 = vsel %vm359_vm3, %v301_v17, %v310_v19  ;;  %v303_v27 = vsel %vm302_vm4, %v297_v20, %v299_v12 }
  0xc3   : > { %915 = vmatpush3.bf16.msra.mxu1 %v382_v23  ;;  %v378_v24 = vsel %vm359_vm3, %v304_v21, %v313_v22  ;;  %v1353_v23 = vrot.slane %v276_v3, %v523_v10 }
  0xc4   : > { %430 = vmatprep.subr.bf16.mxu0 %v378_v24  ;;  %916 = vmatprep.subr.bf16.mxu1 %v1111_v4 }
  0xc5   : > { %v306_v25 = vpop.permute.xlu0 %305  ;;  %v317_v26 = vpop.permute.xlu1 %316 }
  0xc6   : > { %v312_v28 = vsel %vm311_vm5, %v306_v25, %v308_v18 }
  0xc7   : > { %v374_v29 = vsel %vm359_vm3, %v303_v27, %v312_v28 }
  0xc8   : > { %431 = vmatpush1.bf16.msra.mxu0 %v374_v29 }
  0xc9   : > { %v319_v30 = vpop.permute.xlu0 %318  ;;  %v326_v31 = vpop.permute.xlu1 %325 }
  0xca   : > { %v322_v34 = vsel %vm320_vm6, %v317_v26, %v319_v30 }
  0xcd   : > { %v328_v32 = vpop.permute.xlu0 %327  ;;  %v315_v33 = vpop.permute.xlu1 %314 }
  0xce   : > { %v331_v35 = vsel %vm329_vm7, %v326_v31, %v328_v32  ;;  %v394_v36 = vsel %vm359_vm3, %v319_v30, %v328_v32  ;;  %v321_v40 = vsel %vm320_vm6, %v315_v33, %v317_v26 }
  0xcf   : > { %917 = vmatpush3.bf16.msra.mxu1 %v394_v36  ;;  %v390_v37 = vsel %vm359_vm3, %v322_v34, %v331_v35 }
  0xd0   : > { %432 = vmatprep.subr.bf16.mxu0 %v390_v37  ;;  %918 = vmatprep.subr.bf16.mxu1 %v1111_v4 }
  0xd1   : > { %v324_v38 = vpop.permute.xlu0 %323  ;;  %v335_v39 = vpop.permute.xlu1 %334 }
  0xd2   : > { %v330_v41 = vsel %vm329_vm7, %v324_v38, %v326_v31  ;;  %v681_v38 = vld [vmem:[%s1484_s4] sm:$0xff] }
  0xd3   : > { %v386_v42 = vsel %vm359_vm3, %v321_v40, %v330_v41 }
  0xd4   : > { %433 = vmatpush1.bf16.msra.mxu0 %v386_v42 }
  0xd5   : > { %v337_v43 = vpop.permute.xlu0 %336  ;;  %v344_v44 = vpop.permute.xlu1 %343 }
  0xd6   : > { %v340_v47 = vsel %vm338_vm8, %v335_v39, %v337_v43 }
  0xd9   : > { %v346_v45 = vpop.permute.xlu0 %345  ;;  %v333_v46 = vpop.permute.xlu1 %332 }
  0xda   : > { %v349_v48 = vsel %vm347_vm9, %v344_v44, %v346_v45  ;;  %v406_v49 = vsel %vm359_vm3, %v337_v43, %v346_v45  ;;  %v339_v53 = vsel %vm338_vm8, %v333_v46, %v335_v39 }
  0xdb   : > { %919 = vmatpush3.bf16.msra.mxu1 %v406_v49  ;;  %v402_v50 = vsel %vm359_vm3, %v340_v47, %v349_v48 }
  0xdc   : > { %434 = vmatprep.subr.bf16.mxu0 %v402_v50  ;;  %920 = vmatprep.subr.bf16.mxu1 %v1111_v4 }
  0xdd   : > { %v342_v51 = vpop.permute.xlu0 %341  ;;  %v351_v52 = vpop.permute.xlu1 %350 }
  0xde   : > { %v348_v54 = vsel %vm347_vm9, %v342_v51, %v344_v44 }
  0xdf   : > { %v398_v55 = vsel %vm359_vm3, %v339_v53, %v348_v54 }
  0xe0   : > { %435 = vmatpush1.bf16.msra.mxu0 %v398_v55 }
  0xe1   : > { %v353_v56 = vpop.permute.xlu0 %352  ;;  %v355_v57 = vpop.permute.xlu1 %354 }
  0xe2   : > { %v357_v58 = vsel %vm356_vm10, %v351_v52, %v353_v56  ;;  %v358_v59 = vsel %vm356_vm10, %v353_v56, %v355_v57  ;;  %v426_v60 = vsel %vm359_vm3, %v355_v57, 0 }
  0xe3   : > { %884 = vmatprep.subr.msk.bf16.mxu0 %vm359_vm3, %v358_v59  ;;  %921 = vmatpush3.bf16.msra.mxu1 %v426_v60  ;;  %v420_v61 = vsel %vm359_vm3, %v357_v58, 0 }
  0xe4   : > { %437 = vmatpush1.bf16.msra.mxu0 %v420_v61  ;;  %926 = vmatprep.subr.bf16.mxu1 %v1111_v4 }
  0xe6   : > { %923 = vmatmul.mubr.msk.bf16.vlgmr.msra.gmra.mrb[0].mxu1 %vm415_vm11, %v408_v62 }
  0xe7   : > { %885 = vmatmul.mubr.msk.bf16.vlgmr.msra.gmra.mrb[0].mxu0 %vm415_vm11, %v408_v62  ;;  %936 = vmatprep.mubr.msk.bf16.mxu1 %vm1120_vm1, %v1111_v4  ;;  %vm788_vm1 = vcmask 261120  }
  0xe8   : > { %731 = vmatprep.mubr.bf16.mxu0 %v1119_v6 }
  0xf2   : > { %v413_v1 = vpop.permute.xlu0 %412 }
 0x1b9   : > { %v503_v7 = vpop.f32.mrb[0].mxu1 }
 0x1ba   : > { %v462_v8 = vpop.f32.mrb[0].mxu0  ;;  %v504_v9 = vadd.f32 %v503_v7, %v413_v1  ;;  %v924_v11 = vpop.f32.mrb[1].mxu1 }
 0x1bb   : > { %v463_v12 = vadd.f32 %v462_v8, %v413_v1  ;;  %v464_v14 = vpop.f32.mrb[1].mxu0  ;;  %v506_v15 = vpop.f32.mrb[2].mxu1 }
 0x1bc   : > { %v465_v6 = vadd.f32 %v464_v14, %v413_v1  ;;  %v466_v17 = vpop.f32.mrb[2].mxu0  ;;  %v925_v18 = vpop.f32.mrb[3].mxu1  ;;  %v511_v22 = vmax.f32 %v504_v9, 0.0 }
 0x1bd   : > { %v509_v19 = vmax.f32 %v463_v12, 0.0  ;;  %v467_v20 = vpop.f32.mrb[3].mxu0 }
 0x1be   : > { %v510_v21 = vmax.f32 %v465_v6, 0.0  ;;  %v530_v26 = vmul.f32 %v1353_v23, %v511_v22 }
 0x1bf   : > { %v528_v24 = vmul.f32 %v1349_v13, %v509_v19 }
 0x1c0   : > { %v529_v25 = vmul.f32 %v1351_v16, %v510_v21  ;;  %v899_v28 = vpack.c.bf16 %v530_v26, %v530_v26 }
 0x1c2   : > { %v898_v27 = vpack.c.bf16 %v529_v25, %v528_v24 }
 0x1c4   : > { %542 = vrot.lane.b32.xlu1 %v898_v27, %s1122_s26 }
 0x1c8   : > { %544 = vrot.lane.b32.xlu1 %v899_v28, %s1122_s26  ;;  %s1047_s26 = scalar_lea.vmem %s1046_s17, 768 }
 0x236   : > { %v543_v29 = vpop.permute.xlu1 %542 }
 0x237   : > { %v546_v30 = vrot.slane %v543_v29, 4 }
 0x239   : > { %v548_v31 = vsel %vm547_vm14, %v546_v30, %v543_v29 }
 0x23a   : > { %555 = vst.msk [vmem:[#allocation2] sm:$0xff] %vm554_vm15, %v548_v31  ;;  %v545_v32 = vpop.permute.xlu1 %544 }
 0x23b   : > { %v549_v33 = vsel %vm547_vm14, %v546_v30, %v545_v32 }
 0x23c   : > { %557 = vst.msk [vmem:[#allocation2 + $0x8] sm:$0xf] %vm556_vm0, %v549_v33 }
 0x241   : > { %v558_v34 = vld [vmem:[#allocation2] sm:$0xff] }
 0x242   : > { %v890_v35 = vcombine.high %v558_v34, %v558_v34  ;;  %v889_v37 = vcombine.low %v558_v34, %v558_v34 }
 0x243   : > { %v1010_v36 = vld [vmem:[#allocation2 + $0x8] ss:$0 sps:$4 sm:$0xff]  }
 0x244   : > { %570 = vrot.lane.b32.xlu0 %v890_v35, %s1112_s7  ;;  %572 = vrot.lane.b32.xlu1 %v1010_v36, %s1112_s7 }
 0x248   : > { %568 = vrot.lane.b32.xlu0 %v889_v37, %s1112_s7  ;;  %578 = vrot.lane.b32.xlu1 %v890_v35, %s1113_s18 }
 0x24c   : > { %580 = vrot.lane.b32.xlu0 %v1010_v36, %s1113_s18  ;;  %586 = vrot.lane.b32.xlu1 %v890_v35, %s1114_s19 }
 0x250   : > { %588 = vrot.lane.b32.xlu0 %v1010_v36, %s1114_s19  ;;  %576 = vrot.lane.b32.xlu1 %v889_v37, %s1113_s18 }
 0x254   : > { %584 = vrot.lane.b32.xlu0 %v889_v37, %s1114_s19  ;;  %594 = vrot.lane.b32.xlu1 %v890_v35, %s1115_s11 }
 0x258   : > { %596 = vrot.lane.b32.xlu0 %v1010_v36, %s1115_s11  ;;  %602 = vrot.lane.b32.xlu1 %v890_v35, %s1116_s13 }
 0x25c   : > { %604 = vrot.lane.b32.xlu0 %v1010_v36, %s1116_s13  ;;  %592 = vrot.lane.b32.xlu1 %v889_v37, %s1115_s11 }
 0x260   : > { %600 = vrot.lane.b32.xlu0 %v889_v37, %s1116_s13  ;;  %610 = vrot.lane.b32.xlu1 %v890_v35, %s1117_s10  ;;  %s944_s13 = smul.u32 384, %s1180_s25  ;;  %s791_s25 = scalar_lea.sflag [#allocation5], %s1258_s20 }
 0x262   : > { %s1434_s28 = scalar_lea.hbm %s1486_s6, %s944_s13 }
 0x264   : > { %612 = vrot.lane.b32.xlu0 %v1010_v36, %s1117_s10  ;;  %618 = vrot.lane.b32.xlu1 %v890_v35, %s1118_s12 }
 0x268   : > { %620 = vrot.lane.b32.xlu0 %v1010_v36, %s1118_s12  ;;  %608 = vrot.lane.b32.xlu1 %v889_v37, %s1117_s10  ;;  %s805_s10 = sshll.u32 %s1267_s16, 4  ;;  %s1436_s10 = int_to_ptr.vmem [resolvable:$true] %s805_s10 }
 0x269   : > { %s1041_s29 = scalar_lea.vmem %s1436_s10, 384  ;;  %p1048_p10 = scmp.lt.s32.totalorder %s1436_s10, %s1046_s17 }
 0x26a   : > { %p1042_p6 = scmp.ne.s32.totalorder %s1436_s10, %s1041_s29  ;;  %p1049_p2 = scmp.lt.s32.totalorder %s1047_s26, %s1041_s29 }
 0x26c   : > { %616 = vrot.lane.b32.xlu0 %v889_v37, %s1118_s12  ;;  %624 = vrot.lane.b32.xlu1 %v889_v37, %s1121_s14  ;;  %p1043_p13 = pnand %p1042_p6, %p1494_p12  ;;  %p1050_p4 = por %p1049_p2, %p1048_p10 }
 0x26e   : > { %p1044_p5 = pneg %p1043_p13 }
 0x270   : > { %626 = vrot.lane.b32.xlu0 %v890_v35, %s1121_s14  ;;  %628 = vrot.lane.b32.xlu1 %v1010_v36, %s1121_s14  ;;  %p1051_p7 = pnand %p1050_p4, %p1044_p5 }
 0x274   : > { %684 = vperm.xlu0 %1004, %v681_v38  }
 0x2b6   : > { %v571_v39 = vpop.permute.xlu0 %570  ;;  %v573_v40 = vpop.permute.xlu1 %572 }
 0x2b7   : > { %v575_v41 = vsel %vm293_vm2, %v571_v39, %v573_v40  ;;  %v642_v42 = vsel %vm359_vm3, %v1010_v36, %v573_v40 }
 0x2b8   : > { %927 = vmatpush3.bf16.msra.mxu1 %v642_v42  ;;  %v638_v43 = vsel %vm359_vm3, %v890_v35, %v575_v41 }
 0x2b9   : > { %699 = vmatprep.subr.bf16.mxu0 %v638_v43  ;;  %928 = vmatprep.subr.bf16.mxu1 %v1111_v4 }
 0x2ba   : > { %v569_v44 = vpop.permute.xlu0 %568  ;;  %v579_v46 = vpop.permute.xlu1 %578 }
 0x2bb   : > { %v574_v45 = vsel %vm293_vm2, %v569_v44, %v571_v39 }
 0x2bc   : > { %v634_v47 = vsel %vm359_vm3, %v889_v37, %v574_v45 }
 0x2bd   : > { %700 = vmatpush1.bf16.msra.mxu0 %v634_v47 }
 0x2be   : > { %v581_v48 = vpop.permute.xlu0 %580  ;;  %v587_v49 = vpop.permute.xlu1 %586 }
 0x2bf   : > { %v583_v51 = vsel %vm302_vm4, %v579_v46, %v581_v48 }
 0x2c2   : > { %v589_v50 = vpop.permute.xlu0 %588  ;;  %v577_v54 = vpop.permute.xlu1 %576 }
 0x2c3   : > { %v591_v52 = vsel %vm311_vm5, %v587_v49, %v589_v50  ;;  %v654_v53 = vsel %vm359_vm3, %v581_v48, %v589_v50  ;;  %v582_v57 = vsel %vm302_vm4, %v577_v54, %v579_v46 }
 0x2c4   : > { %929 = vmatpush3.bf16.msra.mxu1 %v654_v53  ;;  %v650_v55 = vsel %vm359_vm3, %v583_v51, %v591_v52 }
 0x2c5   : > { %701 = vmatprep.subr.bf16.mxu0 %v650_v55  ;;  %930 = vmatprep.subr.bf16.mxu1 %v1111_v4 }
 0x2c6   : > { %v585_v56 = vpop.permute.xlu0 %584  ;;  %v595_v59 = vpop.permute.xlu1 %594 }
 0x2c7   : > { %v590_v58 = vsel %vm311_vm5, %v585_v56, %v587_v49 }
 0x2c8   : > { %v646_v60 = vsel %vm359_vm3, %v582_v57, %v590_v58 }
 0x2c9   : > { %702 = vmatpush1.bf16.msra.mxu0 %v646_v60 }
 0x2ca   : > { %v597_v61 = vpop.permute.xlu0 %596  ;;  %v603_v62 = vpop.permute.xlu1 %602 }
 0x2cb   : > { %v599_v0 = vsel %vm320_vm6, %v595_v59, %v597_v61 }
 0x2ce   : > { %v605_v63 = vpop.permute.xlu0 %604  ;;  %v593_v3 = vpop.permute.xlu1 %592 }
 0x2cf   : > { %v607_v1 = vsel %vm329_vm7, %v603_v62, %v605_v63  ;;  %v666_v2 = vsel %vm359_vm3, %v597_v61, %v605_v63  ;;  %v598_v8 = vsel %vm320_vm6, %v593_v3, %v595_v59 }
 0x2d0   : > { %931 = vmatpush3.bf16.msra.mxu1 %v666_v2  ;;  %v662_v5 = vsel %vm359_vm3, %v599_v0, %v607_v1 }
 0x2d1   : > { %703 = vmatprep.subr.bf16.mxu0 %v662_v5  ;;  %932 = vmatprep.subr.bf16.mxu1 %v1111_v4 }
 0x2d2   : > { %v601_v7 = vpop.permute.xlu0 %600  ;;  %v611_v10 = vpop.permute.xlu1 %610 }
 0x2d3   : > { %v606_v9 = vsel %vm329_vm7, %v601_v7, %v603_v62 }
 0x2d4   : > { %v658_v11 = vsel %vm359_vm3, %v598_v8, %v606_v9 }
 0x2d5   : > { %704 = vmatpush1.bf16.msra.mxu0 %v658_v11 }
 0x2d6   : > { %v613_v12 = vpop.permute.xlu0 %612  ;;  %v619_v14 = vpop.permute.xlu1 %618 }
 0x2d7   : > { %v615_v6 = vsel %vm338_vm8, %v611_v10, %v613_v12 }
 0x2da   : > { %v621_v15 = vpop.permute.xlu0 %620  ;;  %v609_v19 = vpop.permute.xlu1 %608 }
 0x2db   : > { %v623_v17 = vsel %vm347_vm9, %v619_v14, %v621_v15  ;;  %v678_v18 = vsel %vm359_vm3, %v613_v12, %v621_v15  ;;  %v614_v22 = vsel %vm338_vm8, %v609_v19, %v611_v10 }
 0x2dc   : > { %933 = vmatpush3.bf16.msra.mxu1 %v678_v18  ;;  %v674_v20 = vsel %vm359_vm3, %v615_v6, %v623_v17 }
 0x2dd   : > { %705 = vmatprep.subr.bf16.mxu0 %v674_v20  ;;  %934 = vmatprep.subr.bf16.mxu1 %v1111_v4  ;;  %v680_v4 = vld [vmem:[%s1483_s3] sm:$0xf] }
 0x2de   : > { %v617_v21 = vpop.permute.xlu0 %616  ;;  %v625_v25 = vpop.permute.xlu1 %624 }
 0x2df   : > { %v622_v24 = vsel %vm347_vm9, %v617_v21, %v619_v14 }
 0x2e0   : > { %v670_v26 = vsel %vm359_vm3, %v614_v22, %v622_v24 }
 0x2e1   : > { %706 = vmatpush1.bf16.msra.mxu0 %v670_v26 }
 0x2e2   : > { %v627_v27 = vpop.permute.xlu0 %626  ;;  %v629_v29 = vpop.permute.xlu1 %628 }
 0x2e3   : > { %v630_v28 = vsel %vm356_vm10, %v625_v25, %v627_v27  ;;  %v631_v31 = vsel %vm356_vm10, %v627_v27, %v629_v29  ;;  %v697_v32 = vsel %vm359_vm3, %v629_v29, 0 }
 0x2e4   : > { %v691_v30 = vsel %vm359_vm3, %v630_v28, 0  ;;  %892 = vmatprep.subr.msk.bf16.mxu0 %vm359_vm3, %v631_v31  ;;  %935 = vmatpush3.bf16.msra.mxu1 %v697_v32 }
 0x2e5   : > { %708 = vmatpush1.bf16.msra.mxu0 %v691_v30 }
 0x2e7   : > { %937 = vmatmul.mubr.msk.bf16.vlgmr.msra.gmra.mrb[4].mxu1 %vm415_vm11, %v680_v4 }
 0x2e8   : > { %893 = vmatmul.mubr.msk.bf16.vlgmr.msra.gmra.mrb[4].mxu0 %vm415_vm11, %v680_v4 }
 0x2f3   : > { %v685_v33 = vpop.permute.xlu0 %684 }
 0x3ba   : > { %v774_v34 = vpop.f32.mrb[4].mxu1 }
 0x3bb   : > { %v775_v35 = vadd.f32 %v774_v34, %v685_v33  ;;  %v733_v36 = vpop.f32.mrb[4].mxu0  ;;  %v938_v37 = vpop.f32.mrb[5].mxu1 }
 0x3bc   : > { %v734_v38 = vadd.f32 %v733_v36, %v685_v33  ;;  %v735_v39 = vpop.f32.mrb[5].mxu0  ;;  %v777_v40 = vpop.f32.mrb[6].mxu1 }
 0x3bd   : > { %v782_v41 = vmax.f32 %v775_v35, 0.0  ;;  %v736_v42 = vadd.f32 %v735_v39, %v685_v33  ;;  %v737_v43 = vpop.f32.mrb[6].mxu0  ;;  %v939_v44 = vpop.f32.mrb[7].mxu1 }
 0x3be   : > { %v780_v45 = vmax.f32 %v734_v38, 0.0  ;;  %v738_v46 = vpop.f32.mrb[7].mxu0 }
 0x3bf   : > { %v785_v47 = vmul.f32 %v782_v41, %v1353_v23  ;;  %v781_v48 = vmax.f32 %v736_v42, 0.0 }
 0x3c0   : > { %v783_v49 = vmul.f32 %v780_v45, %v1349_v13 }
 0x3c1   : > { %789 = vst.msk [vmem:[%s1267_s16 + $0x10] sm:$0xff] %vm788_vm1, %v785_v47  ;;  %v784_v50 = vmul.f32 %v781_v48, %v1351_v16 }
 0x3c2   : > { %786 = vst [vmem:[%s1267_s16] sm:$0xff] %v783_v49 }
 0x3c3   : > { %787 = vst [vmem:[%s1267_s16 + $0x8] sm:$0xff] %v784_v50 }
 0x3c4   : > { %1054 = shalt.err (!%p1051_p7)
}
 0x3c5   : > { %s1055_s20 = scalar_lea.hbm %s1434_s28, 384  ;;  %s1059_s18 = scalar_lea.hbm %s1486_s6, 768 }
 0x3c6   : > { %p1056_p8 = scmp.ne.s32.totalorder %s1434_s28, %s1055_s20  ;;  %p1060_p1 = scmp.lt.u32.totalorder %s1434_s28, %s1486_s6 }
 0x3c7   : > { %p1061_p3 = scmp.lt.u32.totalorder %s1059_s18, %s1055_s20  ;;  %p1063_p6 = scmp.lt.u32.totalorder %s1055_s20, %s1434_s28 }
 0x3c8   : > { %p1057_p9 = pnand %p1056_p8, %p1494_p12 }
 0x3c9   : > { %p1062_p11 = por %p1061_p3, %p1060_p1 }
 0x3ca   : > { %p1058_p0 = pneg %p1057_p9 }
 0x3cb   : > { %p1064_p13 = por %p1063_p6, %p1062_p11 }
 0x3cd   : > { %p1065_p5 = pnand %p1064_p13, %p1058_p0 }
 0x3cf   : > { %1068 = shalt.err (!%p1065_p5)
}
 0x3d0   : > { %947 = dma.vmem_to_hbm [thread:$0]  (%p1494_p12), %s1436_s10, 384, %s1434_s28, %s791_s25  }
 0x3d1 PF: > { %s817_s13 = sand.u32 1, %s1095_s21   ;;  %p1495_p10 = scmp.ne.s32.totalorder %s1490_s9, 0 }
 0x3d2   : > { %p1496_p2 = scmp.ge.s32.totalorder %s1107_s24, 2  ;;  %s818_s12 = scalar_lea.sflag [#allocation5], %s817_s13 }
 0x3d4   : > { %p954_p4 = pnand %p1496_p2, %p1495_p10 }
 0x3d6   : > { %1090 = dma.done.wait (!%p954_p4), %s818_s12, 384  }
 0x3d7   : > { %1092 = vsyncadd (!%p954_p4), %s818_s12, 4294966912  ;;  %p19_p7 = scmp.ge.s32.totalorder %s1184_s27, 4   ;;  %s1497_s21 = smov %s1099_s22 }
 0x3d8   : > { %s1498_s22 = smov %s1103_s23  ;;  %s1499_s23 = smov %s1196_s30 }
 0x3d9   : > { %s1500_s24 = smov %s1184_s27  ;;  %21 = sbr.rel (!%p19_p7) target bundleno = 5 (0x5), region = 93 }
 0x3e0   :  { %823 = vsyncpa [#allocation4], 1 }
 0x3e1   :  { %825 = vsyncpa [#allocation4 + $0x1], 1 }
 0x3e2   :  { %826 = vsyncpa [#allocation5], 1 }
 0x3e3   :  { %828 = vsyncpa [#allocation5 + $0x1], 1 }

</bundles_post_ra>
